<compile_context>
chip_gen: v7x
topology: tpu7x:2x2x1
jax: 0.10.0
libtpu: 0.0.40
codegen_flags: <defaults>
</compile_context>

<pallas_src>
import jax
import jax.numpy as jnp
from jax.experimental import pallas as pl
from jax.experimental.pallas import tpu as pltpu


def _round_up(a, b):
    return ((a + b - 1) // b) * b


def gating_kernel(x_ref, w1_ref, b1_ref, w2_ref, b2_ref, o_ref):
    # fc1: in-kernel f32 -> bf16 cast (hidden under the matmul), f32 accumulate.
    x = x_ref[...].astype(jnp.bfloat16)
    h = jnp.dot(x, w1_ref[...], preferred_element_type=jnp.float32)
    h = jnp.maximum(h + b1_ref[...], 0.0)            # (bm, H) + (1, H)

    # fc2: bf16 MXU matmul, f32 accumulate.
    logits = jnp.dot(h.astype(jnp.bfloat16), w2_ref[...],
                     preferred_element_type=jnp.float32)
    logits = logits + b2_ref[...]                    # (bm, E) + (1, E)

    # Numerically stable softmax over the (narrow, E) expert axis.
    m = jnp.max(logits, axis=-1, keepdims=True)
    e = jnp.exp(logits - m)
    denom = jnp.sum(e, axis=-1, keepdims=True)
    o_ref[...] = (e / denom).astype(o_ref.dtype)     # exact normalization


def prepare_gating_params(w1, b1, w2, b2):
    """One-time parameter prep (hoisted out of the per-call path)."""
    return (w1.astype(jnp.bfloat16),
            b1.reshape(1, -1).astype(jnp.float32),
            w2.astype(jnp.bfloat16),
            b2.reshape(1, -1).astype(jnp.float32))


def gating_network(x, params, *, block_m=512):
    """softmax(relu(x @ w1 + b1) @ w2 + b2, axis=-1) via a Pallas TPU kernel."""
    w1b, b1_2d, w2b, b2_2d = params
    B, D = x.shape
    H = w1b.shape[1]
    E = w2b.shape[1]

    # Batch tile: >= 2 grid steps whenever B allows it (v7x dual TensorCore +
    # pipelining), multiples of 8 sublanes, capped at block_m (<= 512 keeps
    # spill pressure modest on v5e).  Ragged tails handled by Pallas.
    bm = max(8, min(block_m, _round_up(pl.cdiv(B, 2), 8)))
    grid = (pl.cdiv(B, bm),)

    itemsize = jnp.dtype(x.dtype).itemsize
    cost = pl.CostEstimate(
        flops=2 * B * (D * H + H * E),
        transcendentals=B * E,
        bytes_accessed=(B * D * itemsize                 # x read (f32, once)
                        + w1b.size * 2 + w2b.size * 2    # bf16 weights
                        + (b1_2d.size + b2_2d.size) * 4  # f32 biases
                        + B * E * itemsize),             # narrow output write
    )

    return pl.pallas_call(
        gating_kernel,
        out_shape=jax.ShapeDtypeStruct((B, E), x.dtype),
        grid=grid,
        in_specs=[
            pl.BlockSpec((bm, D), lambda i: (i, 0)),   # x tile (walks batch)
            pl.BlockSpec((D, H), lambda i: (0, 0)),    # w1 (constant block)
            pl.BlockSpec((1, H), lambda i: (0, 0)),    # b1
            pl.BlockSpec((H, E), lambda i: (0, 0)),    # w2 (constant block)
            pl.BlockSpec((1, E), lambda i: (0, 0)),    # b2
        ],
        out_specs=pl.BlockSpec((bm, E), lambda i: (i, 0)),  # E == full dim
        compiler_params=pltpu.CompilerParams(
            dimension_semantics=("parallel",),          # batch axis shards TCs
            vmem_limit_bytes=8 * 1024 * 1024,           # real footprint < 2 MiB
        ),
        cost_estimate=cost,
    )(x, w1b, b1_2d, w2b, b2_2d)


def gating_network_ref(x, w1, b1, w2, b2):
    h = jax.nn.relu(x @ w1 + b1)
    return jax.nn.softmax(h @ w2 + b2, axis=-1)


if __name__ == "__main__":
    input_dim, hidden, num_experts = 32, 64, 8

    key = jax.random.PRNGKey(0)
    kw1, kb1, kw2, kb2, kx = jax.random.split(key, 5)

    # Deterministic params (shapes from nn.Linear(input_dim, 64),
    # nn.Linear(64, num_experts)); stored transposed: (in, out).
    w1 = jax.random.normal(kw1, (input_dim, hidden), dtype=jnp.float32) * 0.1
    b1 = jax.random.normal(kb1, (hidden,), dtype=jnp.float32) * 0.1
    w2 = jax.random.normal(kw2, (hidden, num_experts), dtype=jnp.float32) * 0.1
    b2 = jax.random.normal(kb2, (num_experts,), dtype=jnp.float32) * 0.1

    params = prepare_gating_params(w1, b1, w2, b2)   # hoisted, done once

    # Cases: divisible 2-step grid, ragged tail block, tiny batch.
    for i, batch in enumerate([256, 200, 16]):
        kx_i = jax.random.fold_in(kx, i)
        x = jax.random.normal(kx_i, (batch, input_dim), dtype=jnp.float32)

        out = jax.block_until_ready(gating_network(x, params, block_m=512))
        ref = gating_network_ref(x, w1, b1, w2, b2)

        assert out.shape == (batch, num_experts)
        # bf16 matmul inputs -> loose-but-tight-enough tolerance vs f32 ref.
        assert jnp.allclose(out, ref, atol=2e-2, rtol=2e-2), \
            float(jnp.max(jnp.abs(out - ref)))
        # Exact divide in-kernel -> rows sum to 1 to ~f32 precision.
        assert jnp.allclose(jnp.sum(out, axis=-1), 1.0, atol=1e-3)

    print("KERNEL_OK")
</pallas_src>

<mosaic_0001>
module attributes {stable_mosaic.version = 11 : i64} {
  func.func @gating_kernel(%arg0: i32, %arg1: memref<128x32xf32, #tpu.memory_space<vmem>>, %arg2: memref<32x64xbf16, #tpu.memory_space<vmem>>, %arg3: memref<1x64xf32, #tpu.memory_space<vmem>>, %arg4: memref<64x8xbf16, #tpu.memory_space<vmem>>, %arg5: memref<1x8xf32, #tpu.memory_space<vmem>>, %arg6: memref<128x8xf32, #tpu.memory_space<vmem>>) attributes {dimension_semantics = [#tpu.dimension_semantics<parallel>], iteration_bounds = array<i64: 2>, scalar_prefetch = 0 : i64, scratch_operands = 0 : i64, tpu.core_type = #tpu.core_type<tc>, window_params = [{transform_indices = @transform_0, window_bounds = array<i64: 128, 32>}, {pipeline_mode = #tpu.pipeline_mode<synchronous>, transform_indices = @transform_1, window_bounds = array<i64: 32, 64>}, {pipeline_mode = #tpu.pipeline_mode<synchronous>, transform_indices = @transform_2, window_bounds = array<i64: 1, 64>}, {pipeline_mode = #tpu.pipeline_mode<synchronous>, transform_indices = @transform_3, window_bounds = array<i64: 64, 8>}, {pipeline_mode = #tpu.pipeline_mode<synchronous>, transform_indices = @transform_4, window_bounds = array<i64: 1, 8>}, {transform_indices = @transform_5, window_bounds = array<i64: 128, 8>}]} {
    %c0 = arith.constant 0 : index
    %c0_0 = arith.constant 0 : index
    %0 = vector.load %arg1[%c0, %c0_0] : memref<128x32xf32, #tpu.memory_space<vmem>>, vector<128x32xf32>
    %1 = arith.truncf %0 : vector<128x32xf32> to vector<128x32xbf16>
    %c0_1 = arith.constant 0 : index
    %c0_2 = arith.constant 0 : index
    %2 = vector.load %arg2[%c0_1, %c0_2] : memref<32x64xbf16, #tpu.memory_space<vmem>>, vector<32x64xbf16>
    %cst = arith.constant dense<0.000000e+00> : vector<128x64xf32>
    %3 = tpu.matmul %1, %2, %cst {dimension_numbers = #tpu.dot_dimension_numbers<[1], [0], [0], [1], [0, 0, 1, 1], [], []>} : vector<128x32xbf16>, vector<32x64xbf16>, vector<128x64xf32> -> vector<128x64xf32>
    %c0_3 = arith.constant 0 : index
    %c0_4 = arith.constant 0 : index
    %4 = vector.load %arg3[%c0_3, %c0_4] : memref<1x64xf32, #tpu.memory_space<vmem>>, vector<1x64xf32>
    %5 = vector.broadcast %4 : vector<1x64xf32> to vector<128x64xf32>
    %6 = arith.addf %3, %5 : vector<128x64xf32>
    %cst_5 = arith.constant 0.000000e+00 : f32
    %7 = vector.broadcast %cst_5 : f32 to vector<128x64xf32>
    %8 = arith.maximumf %6, %7 : vector<128x64xf32>
    %9 = arith.truncf %8 : vector<128x64xf32> to vector<128x64xbf16>
    %c0_6 = arith.constant 0 : index
    %c0_7 = arith.constant 0 : index
    %10 = vector.load %arg4[%c0_6, %c0_7] : memref<64x8xbf16, #tpu.memory_space<vmem>>, vector<64x8xbf16>
    %cst_8 = arith.constant dense<0.000000e+00> : vector<128x8xf32>
    %11 = tpu.matmul %9, %10, %cst_8 {dimension_numbers = #tpu.dot_dimension_numbers<[1], [0], [0], [1], [0, 0, 1, 1], [], []>} : vector<128x64xbf16>, vector<64x8xbf16>, vector<128x8xf32> -> vector<128x8xf32>
    %c0_9 = arith.constant 0 : index
    %c0_10 = arith.constant 0 : index
    %12 = vector.load %arg5[%c0_9, %c0_10] : memref<1x8xf32, #tpu.memory_space<vmem>>, vector<1x8xf32>
    %13 = vector.broadcast %12 : vector<1x8xf32> to vector<128x8xf32>
    %14 = arith.addf %11, %13 : vector<128x8xf32>
    %cst_11 = arith.constant dense<0xFF800000> : vector<128xf32>
    %15 = vector.multi_reduction <maximumf>, %14, %cst_11 [1] : vector<128x8xf32> to vector<128xf32>
    %16 = vector.shape_cast %15 : vector<128xf32> to vector<128x1xf32>
    %17 = vector.broadcast %16 : vector<128x1xf32> to vector<128x8xf32>
    %18 = arith.subf %14, %17 : vector<128x8xf32>
    %19 = math.exp %18 : vector<128x8xf32>
    %cst_12 = arith.constant dense<0.000000e+00> : vector<128xf32>
    %20 = vector.multi_reduction <add>, %19, %cst_12 [1] : vector<128x8xf32> to vector<128xf32>
    %21 = vector.shape_cast %20 : vector<128xf32> to vector<128x1xf32>
    %22 = vector.broadcast %21 : vector<128x1xf32> to vector<128x8xf32>
    %23 = arith.divf %19, %22 : vector<128x8xf32>
    %c0_13 = arith.constant 0 : index
    %c0_14 = arith.constant 0 : index
    %24 = vector.load %arg6[%c0_13, %c0_14] : memref<128x8xf32, #tpu.memory_space<vmem>>, vector<128x8xf32>
    tpu.vector_store %arg6[%c0_13, %c0_14], %23 {strides = array<i32>} : memref<128x8xf32, #tpu.memory_space<vmem>>, vector<128x8xf32>,
    return
  }
  func.func @transform_0(%arg0: i32) -> (i32, i32) {
    %c0_i32 = arith.constant 0 : i32
    %c0_i32_0 = arith.constant 0 : i32
    return %arg0, %c0_i32 : i32, i32
  }
  func.func @transform_1(%arg0: i32) -> (i32, i32) {
    %c0_i32 = arith.constant 0 : i32
    %c0_i32_0 = arith.constant 0 : i32
    %c0_i32_1 = arith.constant 0 : i32
    return %c0_i32, %c0_i32_0 : i32, i32
  }
  func.func @transform_2(%arg0: i32) -> (i32, i32) {
    %c0_i32 = arith.constant 0 : i32
    %c0_i32_0 = arith.constant 0 : i32
    %c0_i32_1 = arith.constant 0 : i32
    return %c0_i32, %c0_i32_0 : i32, i32
  }
  func.func @transform_3(%arg0: i32) -> (i32, i32) {
    %c0_i32 = arith.constant 0 : i32
    %c0_i32_0 = arith.constant 0 : i32
    %c0_i32_1 = arith.constant 0 : i32
    return %c0_i32, %c0_i32_0 : i32, i32
  }
  func.func @transform_4(%arg0: i32) -> (i32, i32) {
    %c0_i32 = arith.constant 0 : i32
    %c0_i32_0 = arith.constant 0 : i32
    %c0_i32_1 = arith.constant 0 : i32
    return %c0_i32, %c0_i32_0 : i32, i32
  }
  func.func @transform_5(%arg0: i32) -> (i32, i32) {
    %c0_i32 = arith.constant 0 : i32
    %c0_i32_0 = arith.constant 0 : i32
    return %arg0, %c0_i32 : i32, i32
  }
}

</mosaic_0001>

<bundles_post_ra>
// kernel: tpu_custom_call.1
= control target key start
LH: loop header
LB: loop body
LE: loop exit
PB: predicated region body
PF: predicated region fallthrough
CT: control target
= control target key end

     0   :  { %s1049_s18 = smov 0   ;;  %s1325_s0 = inlined_call_operand.vmem [shape: f32[256,32], index: 0, kind: input, shape index: {}]   ;;  %s1326_s1 = inlined_call_operand.vmem [shape: bf16[32,64], index: 1, kind: input, shape index: {}]   ;;  %s1327_s2 = inlined_call_operand.vmem [shape: f32[1,64], index: 2, kind: input, shape index: {}]   ;;  %s1328_s3 = inlined_call_operand.vmem [shape: bf16[64,8], index: 3, kind: input, shape index: {}]   ;;  %s1329_s4 = inlined_call_operand.vmem [shape: f32[1,8], index: 4, kind: input, shape index: {}]   ;;  %s1330_s5 = inlined_call_operand.vmem [shape: f32[256,8], index: 5, kind: output, shape index: {}]  }
   0x1 LB: > { %s832_s19 = sadd.s32 4294967295, %s1017_s18   ;;  %p836_p0 = scmp.ge.s32.totalorder %s1017_s18, 1  ;;  %s1017_s18 = sphi %s1049_s18, %s15_s18  }
   0x2   : > { %p188_p1 = scmp.lt.s32.totalorder %s1017_s18, 3 }
   0x4   : > { %p189_p2 = pnand %p836_p0, %p188_p1 }
   0x5   : > { %v941_v0 = vld [vmem:[%s1326_s1] sm:$0xff] (!%p189_p2)   ;;  %s837_s22 = sshll.u32 (!%p189_p2), %s832_s19, 4  ;;  %v942_v1 = vld [vmem:[%s1326_s1 + $0x8] sm:$0xff] (!%p189_p2)   ;;  %vm276_vm0 = vcmask (!%p189_p2), 261120   ;;  %v945_v28 = vld [vmem:[%s1328_s3 + $0x10] sm:$0xff] (!%p189_p2)   ;;  %vm461_vm1 = vcmask (!%p189_p2), 523264  }
   0x6   : > { %192 = sbr.rel (%p189_p2) target bundleno = 803 (0x323), region = 40  ;;  %p217_p3 = scmp.lt.s32.totalorder (!%p189_p2), %s837_s22, 31  ;;  %889 = vmatprep.subr.bf16.mxu0 (!%p189_p2), %v941_v0  ;;  %v943_v2 = vld [vmem:[%s1328_s3] sm:$0xff] (!%p189_p2)   ;;  %v944_v3 = vld [vmem:[%s1328_s3 + $0x8] sm:$0xff] (!%p189_p2)   ;;  %v946_v29 = vld [vmem:[%s1328_s3 + $0x18] sm:$0xff] (!%p189_p2)   ;;  %vm583_vm2 = vcmask (!%p189_p2), 64512  }
   0x7   : > { %890 = vmatpush3.bf16.msra.mxu0 (!%p189_p2), %v941_v0  ;;  %909 = vmatprep.subr.bf16.mxu1 (!%p189_p2), %v943_v2  ;;  %v841_v30 = vld [vmem:[%s1327_s2] ss:$0 sm:$0xff] (!%p189_p2) }
   0x8   : > { %891 = vmatprep.subr.bf16.mxu0 (!%p189_p2), %v942_v1  ;;  %910 = vmatpush3.bf16.msra.mxu1 (!%p189_p2), %v943_v2 }
   0x9   : > { %911 = vmatprep.subr.bf16.mxu1 (!%p189_p2), %v944_v3 }
   0xb   : > { %892 = vmatpush3.bf16.msra.mxu0 (!%p189_p2), %v942_v1 }
   0xc   : > { %912 = vmatpush3.bf16.msra.mxu1 (!%p189_p2), %v944_v3 }
   0xd   : > { %s1332_s22 = smov (!%p217_p3, %s837_s22), 31  ;;  %913 = vmatprep.subr.bf16.mxu1 %v945_v28 }
   0xe   : > { %s838_s29 = sshll.u32 %s1332_s22, 3 }
   0xf   : > { %s1077_s7 = scalar_lea.vmem %s1325_s0, %s838_s29  ;;  %s1272_s19 = scalar_lea.vmem %s1330_s5, %s838_s29 }
  0x10   : > { %v229_v4 = vld [vmem:[%s1077_s7] sm:$0xff]  ;;  %v230_v5 = vld [vmem:[%s1077_s7 + $0x8] sm:$0xff]  ;;  %v231_v6 = vld [vmem:[%s1077_s7 + $0x10] sm:$0xff]  ;;  %914 = vmatpush3.bf16.msra.mxu1 %v945_v28 }
  0x11   : > { %v245_v7 = vpack.c.bf16 %v230_v5, %v229_v4  ;;  %v232_v8 = vld [vmem:[%s1077_s7 + $0x18] sm:$0xff]  ;;  %v233_v9 = vld [vmem:[%s1077_s7 + $0x20] sm:$0xff]  ;;  %v234_v10 = vld [vmem:[%s1077_s7 + $0x28] sm:$0xff]  ;;  %915 = vmatprep.subr.bf16.mxu1 %v946_v29 }
  0x12   : > { %v246_v11 = vpack.c.bf16 %v232_v8, %v231_v6  ;;  %v247_v12 = vpack.c.bf16 %v234_v10, %v233_v9  ;;  %v235_v13 = vld [vmem:[%s1077_s7 + $0x30] sm:$0xff]  ;;  %v236_v14 = vld [vmem:[%s1077_s7 + $0x38] sm:$0xff]  ;;  %v237_v15 = vld [vmem:[%s1077_s7 + $0x40] sm:$0xff] }
  0x13   : > { %893 = vmatprep.mubr.msk.bf16.mxu0 %vm276_vm0, %v245_v7  ;;  %v238_v16 = vld [vmem:[%s1077_s7 + $0x48] sm:$0xff]  ;;  %v248_v17 = vpack.c.bf16 %v236_v14, %v235_v13  ;;  %v239_v19 = vld [vmem:[%s1077_s7 + $0x50] sm:$0xff]  ;;  %v240_v20 = vld [vmem:[%s1077_s7 + $0x58] sm:$0xff] }
  0x14   : > { %894 = vmatmul.mubr.msk.bf16.vlgmr.msra.gmra.mrb[0].mxu0 %vm276_vm0, %v246_v11  ;;  %v249_v18 = vpack.c.bf16 %v238_v16, %v237_v15  ;;  %v241_v21 = vld [vmem:[%s1077_s7 + $0x60] sm:$0xff]  ;;  %v242_v22 = vld [vmem:[%s1077_s7 + $0x68] sm:$0xff]  ;;  %v250_v23 = vpack.c.bf16 %v240_v20, %v239_v19  ;;  %v243_v25 = vld [vmem:[%s1077_s7 + $0x70] sm:$0xff]  ;;  %916 = vmatpush3.bf16.msra.mxu1 %v946_v29 }
  0x15   : > { %897 = vmatprep.mubr.msk.bf16.mxu0 %vm276_vm0, %v247_v12  ;;  %v251_v24 = vpack.c.bf16 %v242_v22, %v241_v21  ;;  %v244_v26 = vld [vmem:[%s1077_s7 + $0x78] sm:$0xff] }
  0x16   : > { %v252_v27 = vpack.c.bf16 %v244_v26, %v243_v25 }
  0x1c   : > { %898 = vmatmul.mubr.msk.bf16.gmra.mrb[4].mxu0 %vm276_vm0, %v248_v17 }
  0x1d   : > { %901 = vmatprep.mubr.msk.bf16.mxu0 %vm276_vm0, %v249_v18 }
  0x24   : > { %902 = vmatmul.mubr.msk.bf16.gmra.mrb[8].mxu0 %vm276_vm0, %v250_v23  ;;  %v852_v23 = vld [vmem:[%s1329_s4] ss:$0 sm:$0xff] }
  0x25   : > { %905 = vmatprep.mubr.msk.bf16.mxu0 %vm276_vm0, %v251_v24 }
  0x2c   : > { %906 = vmatmul.mubr.msk.bf16.gmra.mrb[12].mxu0 %vm276_vm0, %v252_v27 }
  0xe7   : > { %v895_v31 = vpop.f32.mrb[0].mxu0 }
  0xe8   : > { %v344_v32 = vadd.f32 %v895_v31, %v841_v30  ;;  %v335_v33 = vpop.f32.mrb[1].mxu0 }
  0xe9   : > { %v336_v34 = vadd.f32 %v841_v30, %v335_v33  ;;  %v896_v35 = vpop.f32.mrb[2].mxu0 }
  0xea   : > { %v347_v36 = vadd.f32 %v896_v35, %v841_v30  ;;  %v338_v37 = vpop.f32.mrb[3].mxu0  ;;  %v400_v39 = vmax.f32 %v344_v32, 0.0 }
  0xeb   : > { %v339_v38 = vadd.f32 %v841_v30, %v338_v37  ;;  %v398_v41 = vmax.f32 %v336_v34, 0.0 }
  0xec   : > { %v401_v40 = vmax.f32 %v347_v36, 0.0 }
  0xed   : > { %v399_v42 = vmax.f32 %v339_v38, 0.0 }
  0xee   : > { %v415_v43 = vpack.c.bf16 %v401_v40, %v400_v39 }
  0xef   : > { %v899_v44 = vpop.f32.mrb[4].mxu0  ;;  %v414_v45 = vpack.c.bf16 %v399_v42, %v398_v41 }
  0xf0   : > { %v360_v46 = vadd.f32 %v899_v44, %v841_v30  ;;  %v351_v47 = vpop.f32.mrb[5].mxu0 }
  0xf1   : > { %v352_v48 = vadd.f32 %v841_v30, %v351_v47  ;;  %v900_v49 = vpop.f32.mrb[6].mxu0  ;;  %917 = vmatprep.mubr.msk.bf16.mxu1 %vm461_vm1, %v414_v45 }
  0xf2   : > { %v404_v50 = vmax.f32 %v360_v46, 0.0  ;;  %v363_v51 = vadd.f32 %v900_v49, %v841_v30  ;;  %v354_v52 = vpop.f32.mrb[7].mxu0  ;;  %918 = vmatmul.mubr.msk.bf16.vlgmr.msra.gmra.mrb[0].mxu1 %vm461_vm1, %v415_v43 }
  0xf3   : > { %v355_v53 = vadd.f32 %v841_v30, %v354_v52  ;;  %v402_v55 = vmax.f32 %v352_v48, 0.0 }
  0xf4   : > { %v405_v54 = vmax.f32 %v363_v51, 0.0 }
  0xf5   : > { %v403_v56 = vmax.f32 %v355_v53, 0.0 }
  0xf6   : > { %v417_v57 = vpack.c.bf16 %v405_v54, %v404_v50 }
  0xf7   : > { %v416_v58 = vpack.c.bf16 %v403_v56, %v402_v55  ;;  %v903_v59 = vpop.f32.mrb[8].mxu0 }
  0xf8   : > { %v376_v60 = vadd.f32 %v903_v59, %v841_v30  ;;  %v367_v61 = vpop.f32.mrb[9].mxu0 }
  0xf9   : > { %v368_v62 = vadd.f32 %v841_v30, %v367_v61  ;;  %v904_v63 = vpop.f32.mrb[10].mxu0  ;;  %921 = vmatprep.mubr.msk.bf16.mxu1 %vm461_vm1, %v416_v58 }
  0xfa   : > { %v408_v0 = vmax.f32 %v376_v60, 0.0  ;;  %v379_v1 = vadd.f32 %v904_v63, %v841_v30  ;;  %v370_v2 = vpop.f32.mrb[11].mxu0  ;;  %922 = vmatmul.mubr.msk.bf16.gmra.mrb[4].mxu1 %vm461_vm1, %v417_v57 }
  0xfb   : > { %v371_v3 = vadd.f32 %v841_v30, %v370_v2  ;;  %v406_v5 = vmax.f32 %v368_v62, 0.0 }
  0xfc   : > { %v409_v4 = vmax.f32 %v379_v1, 0.0 }
  0xfd   : > { %v407_v6 = vmax.f32 %v371_v3, 0.0 }
  0xfe   : > { %v419_v7 = vpack.c.bf16 %v409_v4, %v408_v0 }
  0xff   : > { %v418_v8 = vpack.c.bf16 %v407_v6, %v406_v5  ;;  %v907_v9 = vpop.f32.mrb[12].mxu0 }
 0x100   : > { %v392_v10 = vadd.f32 %v907_v9, %v841_v30  ;;  %v383_v11 = vpop.f32.mrb[13].mxu0 }
 0x101   : > { %v384_v12 = vadd.f32 %v841_v30, %v383_v11  ;;  %v908_v13 = vpop.f32.mrb[14].mxu0  ;;  %925 = vmatprep.mubr.msk.bf16.mxu1 %vm461_vm1, %v418_v8 }
 0x102   : > { %v412_v14 = vmax.f32 %v392_v10, 0.0  ;;  %v395_v15 = vadd.f32 %v908_v13, %v841_v30  ;;  %v386_v16 = vpop.f32.mrb[15].mxu0  ;;  %926 = vmatmul.mubr.msk.bf16.gmra.mrb[8].mxu1 %vm461_vm1, %v419_v7 }
 0x103   : > { %v387_v17 = vadd.f32 %v841_v30, %v386_v16  ;;  %v410_v19 = vmax.f32 %v384_v12, 0.0 }
 0x104   : > { %v413_v18 = vmax.f32 %v395_v15, 0.0 }
 0x105   : > { %v411_v20 = vmax.f32 %v387_v17, 0.0 }
 0x106   : > { %v421_v21 = vpack.c.bf16 %v413_v18, %v412_v14 }
 0x107   : > { %v420_v22 = vpack.c.bf16 %v411_v20, %v410_v19 }
 0x109   : > { %929 = vmatprep.mubr.msk.bf16.mxu1 %vm461_vm1, %v420_v22 }
 0x10a   : > { %930 = vmatmul.mubr.msk.bf16.gmra.mrb[12].mxu1 %vm461_vm1, %v421_v21 }
 0x1c5   : > { %v919_v24 = vpop.f32.mrb[0].mxu1 }
 0x1c6   : > { %v1123_v25 = vadd.f32 %v919_v24, %v852_v23  ;;  %v520_v26 = vpop.f32.mrb[1].mxu1 }
 0x1c7   : > { %v1125_v27 = vadd.f32 %v852_v23, %v520_v26  ;;  %v920_v28 = vpop.f32.mrb[2].mxu1 }
 0x1c8   : > { %v1127_v29 = vadd.f32 %v920_v28, %v852_v23  ;;  %v523_v30 = vpop.f32.mrb[3].mxu1  ;;  %v590_v31 = vsel %vm583_vm2, %v1123_v25, -inf }
 0x1c9   : > { %v1131_v32 = vadd.f32 %v852_v23, %v523_v30  ;;  %591 = vmax.xlane.f32.xlu1 %v590_v31  ;;  %v584_v33 = vsel %vm583_vm2, %v1125_v27, -inf }
 0x1ca   : > { %585 = vmax.xlane.f32.xlu0 %v584_v33  ;;  %v593_v34 = vsel %vm583_vm2, %v1127_v29, -inf }
 0x1cb   : > { %v587_v36 = vsel %vm583_vm2, %v1131_v32, -inf }
 0x1cd   : > { %594 = vmax.xlane.f32.xlu1 %v593_v34  ;;  %v923_v35 = vpop.f32.mrb[4].mxu1 }
 0x1ce   : > { %v1139_v37 = vadd.f32 %v923_v35, %v852_v23  ;;  %v536_v38 = vpop.f32.mrb[5].mxu1  ;;  %588 = vmax.xlane.f32.xlu0 %v587_v36 }
 0x1cf   : > { %v924_v39 = vpop.f32.mrb[6].mxu1  ;;  %v1145_v43 = vadd.f32 %v852_v23, %v536_v38 }
 0x1d0   : > { %v1141_v40 = vadd.f32 %v924_v39, %v852_v23  ;;  %v539_v41 = vpop.f32.mrb[7].mxu1  ;;  %v602_v42 = vsel %vm583_vm2, %v1139_v37, -inf }
 0x1d1   : > { %v1147_v44 = vadd.f32 %v852_v23, %v539_v41  ;;  %v596_v47 = vsel %vm583_vm2, %v1145_v43, -inf }
 0x1d2   : > { %603 = vmax.xlane.f32.xlu0 %v602_v42  ;;  %v605_v45 = vsel %vm583_vm2, %v1141_v40, -inf }
 0x1d3   : > { %606 = vmax.xlane.f32.xlu1 %v605_v45  ;;  %v599_v50 = vsel %vm583_vm2, %v1147_v44, -inf }
 0x1d5   : > { %v927_v46 = vpop.f32.mrb[8].mxu1 }
 0x1d6   : > { %v1153_v48 = vadd.f32 %v927_v46, %v852_v23  ;;  %v552_v49 = vpop.f32.mrb[9].mxu1  ;;  %597 = vmax.xlane.f32.xlu0 %v596_v47 }
 0x1d7   : > { %v928_v51 = vpop.f32.mrb[10].mxu1  ;;  %600 = vmax.xlane.f32.xlu1 %v599_v50  ;;  %v1161_v55 = vadd.f32 %v852_v23, %v552_v49 }
 0x1d8   : > { %v1157_v52 = vadd.f32 %v928_v51, %v852_v23  ;;  %v555_v53 = vpop.f32.mrb[11].mxu1  ;;  %v614_v54 = vsel %vm583_vm2, %v1153_v48, -inf }
 0x1d9   : > { %v1163_v56 = vadd.f32 %v852_v23, %v555_v53  ;;  %v608_v59 = vsel %vm583_vm2, %v1161_v55, -inf }
 0x1da   : > { %615 = vmax.xlane.f32.xlu0 %v614_v54  ;;  %v617_v57 = vsel %vm583_vm2, %v1157_v52, -inf }
 0x1db   : > { %618 = vmax.xlane.f32.xlu1 %v617_v57  ;;  %v611_v61 = vsel %vm583_vm2, %v1163_v56, -inf }
 0x1dd   : > { %v931_v58 = vpop.f32.mrb[12].mxu1 }
 0x1de   : > { %v568_v60 = vpop.f32.mrb[13].mxu1  ;;  %609 = vmax.xlane.f32.xlu0 %v608_v59  ;;  %v1173_v1 = vadd.f32 %v931_v58, %v852_v23 }
 0x1df   : > { %v1171_v62 = vadd.f32 %v852_v23, %v568_v60  ;;  %v932_v63 = vpop.f32.mrb[14].mxu1  ;;  %612 = vmax.xlane.f32.xlu1 %v611_v61 }
 0x1e0   : > { %v571_v0 = vpop.f32.mrb[15].mxu1  ;;  %v1179_v4 = vadd.f32 %v932_v63, %v852_v23  ;;  %v626_v6 = vsel %vm583_vm2, %v1173_v1, -inf }
 0x1e1   : > { %v1175_v2 = vadd.f32 %v852_v23, %v571_v0  ;;  %v620_v3 = vsel %vm583_vm2, %v1171_v62, -inf }
 0x1e2   : > { %621 = vmax.xlane.f32.xlu0 %v620_v3  ;;  %v629_v7 = vsel %vm583_vm2, %v1179_v4, -inf }
 0x1e3   : > { %v623_v5 = vsel %vm583_vm2, %v1175_v2, -inf }
 0x1e4   : > { %624 = vmax.xlane.f32.xlu1 %v623_v5 }
 0x1e6   : > { %627 = vmax.xlane.f32.xlu0 %v626_v6 }
 0x1e8   : > { %630 = vmax.xlane.f32.xlu1 %v629_v7 }
 0x256   : > { %v592_v8 = vpop.xlane.xlu1 %591 }
 0x257   : > { %v634_v9 = vsub.f32 %v1123_v25, %v592_v8  ;;  %v586_v10 = vpop.xlane.xlu0 %585 }
 0x258   : > { %v632_v11 = vsub.f32 %v1125_v27, %v586_v10 }
 0x259   : > { %v652_v12 = vmul.f32 1.442695, %v634_v9 }
 0x25a   : > { %v648_v13 = vmul.f32 1.442695, %v632_v11  ;;  %v595_v14 = vpop.xlane.xlu1 %594 }
 0x25b   : > { %947 = vpow2.f32 %v652_v12  ;;  %v635_v15 = vsub.f32 %v1127_v29, %v595_v14  ;;  %v589_v16 = vpop.xlane.xlu0 %588 }
 0x25c   : > { %v633_v17 = vsub.f32 %v1131_v32, %v589_v16  ;;  %949 = vpow2.f32 %v648_v13 }
 0x25d   : > { %v654_v18 = vmul.f32 1.442695, %v635_v15 }
 0x25e   : > { %v650_v19 = vmul.f32 1.442695, %v633_v17 }
 0x25f   : > { %951 = vpow2.f32 %v654_v18  ;;  %v604_v20 = vpop.xlane.xlu0 %603 }
 0x260   : > { %v638_v21 = vsub.f32 %v1139_v37, %v604_v20  ;;  %v607_v22 = vpop.xlane.xlu1 %606  ;;  %953 = vpow2.f32 %v650_v19 }
 0x261   : > { %v639_v23 = vsub.f32 %v1141_v40, %v607_v22 }
 0x262   : > { %v660_v24 = vmul.f32 1.442695, %v638_v21 }
 0x263   : > { %v662_v25 = vmul.f32 1.442695, %v639_v23  ;;  %v598_v26 = vpop.xlane.xlu0 %597 }
 0x264   : > { %955 = vpow2.f32 %v660_v24  ;;  %v636_v27 = vsub.f32 %v1145_v43, %v598_v26  ;;  %v601_v28 = vpop.xlane.xlu1 %600 }
 0x265   : > { %v1194_v29 = vpop.eup %947  ;;  %957 = vpow2.f32 %v662_v25  ;;  %v637_v30 = vsub.f32 %v1147_v44, %v601_v28 }
 0x266   : > { %v656_v31 = vmul.f32 1.442695, %v636_v27  ;;  %v686_v32 = vsel %vm583_vm2, %v1194_v29, 0.0  ;;  %v1199_v33 = vpop.eup %949 }
 0x267   : > { %v658_v34 = vmul.f32 1.442695, %v637_v30  ;;  %687 = vadd.xlane.f32.xlu0 %v686_v32  ;;  %v616_v35 = vpop.xlane.xlu0 %615  ;;  %v680_v42 = vsel %vm583_vm2, %v1199_v33, 0.0 }
 0x268   : > { %959 = vpow2.f32 %v656_v31  ;;  %v642_v36 = vsub.f32 %v1153_v48, %v616_v35  ;;  %v619_v37 = vpop.xlane.xlu1 %618 }
 0x269   : > { %v1202_v38 = vpop.eup %951  ;;  %961 = vpow2.f32 %v658_v34  ;;  %v643_v39 = vsub.f32 %v1157_v52, %v619_v37 }
 0x26a   : > { %v668_v40 = vmul.f32 1.442695, %v642_v36  ;;  %v689_v41 = vsel %vm583_vm2, %v1202_v38, 0.0  ;;  %v1209_v43 = vpop.eup %953 }
 0x26b   : > { %v670_v44 = vmul.f32 1.442695, %v643_v39  ;;  %690 = vadd.xlane.f32.xlu1 %v689_v41  ;;  %681 = vadd.xlane.f32.xlu0 %v680_v42  ;;  %v610_v45 = vpop.xlane.xlu0 %609  ;;  %v683_v51 = vsel %vm583_vm2, %v1209_v43, 0.0 }
 0x26c   : > { %963 = vpow2.f32 %v668_v40  ;;  %v640_v46 = vsub.f32 %v1161_v55, %v610_v45  ;;  %v613_v47 = vpop.xlane.xlu1 %612 }
 0x26d   : > { %965 = vpow2.f32 %v670_v44  ;;  %v641_v48 = vsub.f32 %v1163_v56, %v613_v47 }
 0x26e   : > { %v1213_v49 = vpop.eup %955  ;;  %v664_v50 = vmul.f32 1.442695, %v640_v46 }
 0x26f   : > { %v1217_v52 = vpop.eup %957  ;;  %v666_v53 = vmul.f32 1.442695, %v641_v48  ;;  %684 = vadd.xlane.f32.xlu1 %v683_v51  ;;  %v622_v54 = vpop.xlane.xlu0 %621  ;;  %v698_v57 = vsel %vm583_vm2, %v1213_v49, 0.0 }
 0x270   : > { %967 = vpow2.f32 %v664_v50  ;;  %v644_v55 = vsub.f32 %v1171_v62, %v622_v54  ;;  %699 = vadd.xlane.f32.xlu0 %v698_v57  ;;  %v701_v61 = vsel %vm583_vm2, %v1217_v52, 0.0 }
 0x271   : > { %969 = vpow2.f32 %v666_v53  ;;  %v625_v56 = vpop.xlane.xlu1 %624 }
 0x272   : > { %v1222_v58 = vpop.eup %959  ;;  %v672_v59 = vmul.f32 1.442695, %v644_v55  ;;  %v645_v60 = vsub.f32 %v1175_v2, %v625_v56 }
 0x273   : > { %v1227_v63 = vpop.eup %961  ;;  %702 = vadd.xlane.f32.xlu1 %v701_v61  ;;  %v628_v0 = vpop.xlane.xlu0 %627  ;;  %v692_v3 = vsel %vm583_vm2, %v1222_v58, 0.0 }
 0x274   : > { %971 = vpow2.f32 %v672_v59  ;;  %v674_v62 = vmul.f32 1.442695, %v645_v60  ;;  %v646_v5 = vsub.f32 %v1173_v1, %v628_v0  ;;  %693 = vadd.xlane.f32.xlu0 %v692_v3  ;;  %v695_v9 = vsel %vm583_vm2, %v1227_v63, 0.0 }
 0x275   : > { %v631_v6 = vpop.xlane.xlu1 %630 }
 0x276   : > { %v1232_v7 = vpop.eup %963  ;;  %973 = vpow2.f32 %v674_v62  ;;  %v676_v2 = vmul.f32 1.442695, %v646_v5  ;;  %v647_v8 = vsub.f32 %v1179_v4, %v631_v6 }
 0x277   : > { %v1237_v10 = vpop.eup %965  ;;  %696 = vadd.xlane.f32.xlu1 %v695_v9  ;;  %v710_v11 = vsel %vm583_vm2, %v1232_v7, 0.0 }
 0x278   : > { %975 = vpow2.f32 %v676_v2  ;;  %v678_v12 = vmul.f32 1.442695, %v647_v8  ;;  %711 = vadd.xlane.f32.xlu0 %v710_v11  ;;  %v713_v13 = vsel %vm583_vm2, %v1237_v10, 0.0 }
 0x27a   : > { %v1241_v1 = vpop.eup %967  ;;  %977 = vpow2.f32 %v678_v12 }
 0x27b   : > { %v1245_v14 = vpop.eup %969  ;;  %714 = vadd.xlane.f32.xlu1 %v713_v13  ;;  %v704_v4 = vsel %vm583_vm2, %v1241_v1, 0.0 }
 0x27c   : > { %705 = vadd.xlane.f32.xlu0 %v704_v4  ;;  %v707_v16 = vsel %vm583_vm2, %v1245_v14, 0.0 }
 0x27e   : > { %v1249_v15 = vpop.eup %971 }
 0x27f   : > { %708 = vadd.xlane.f32.xlu1 %v707_v16  ;;  %v716_v17 = vsel %vm583_vm2, %v1249_v15, 0.0 }
 0x280   : > { %v1255_v18 = vpop.eup %973  ;;  %717 = vadd.xlane.f32.xlu0 %v716_v17 }
 0x281   : > { %v719_v19 = vsel %vm583_vm2, %v1255_v18, 0.0 }
 0x282   : > { %v1259_v20 = vpop.eup %975 }
 0x283   : > { %720 = vadd.xlane.f32.xlu1 %v719_v19  ;;  %v722_v21 = vsel %vm583_vm2, %v1259_v20, 0.0 }
 0x284   : > { %v1263_v22 = vpop.eup %977  ;;  %723 = vadd.xlane.f32.xlu0 %v722_v21 }
 0x285   : > { %v725_v23 = vsel %vm583_vm2, %v1263_v22, 0.0 }
 0x287   : > { %726 = vadd.xlane.f32.xlu1 %v725_v23 }
 0x2f4   : > { %v688_v24 = vpop.xlane.xlu0 %687 }
 0x2f5   : > { %979 = vrcp.f32 %v688_v24 }
 0x2f8   : > { %v691_v25 = vpop.xlane.xlu1 %690  ;;  %v682_v26 = vpop.xlane.xlu0 %681 }
 0x2f9   : > { %981 = vrcp.f32 %v691_v25 }
 0x2fa   : > { %983 = vrcp.f32 %v682_v26 }
 0x2fc   : > { %v685_v27 = vpop.xlane.xlu1 %684 }
 0x2fd   : > { %985 = vrcp.f32 %v685_v27  ;;  %v700_v28 = vpop.xlane.xlu0 %699 }
 0x2fe   : > { %987 = vrcp.f32 %v700_v28 }
 0x2ff   : > { %v980_v30 = vpop.eup %979 }
 0x300   : > { %v733_v31 = vmul.f32 %v980_v30, %v1194_v29  ;;  %v703_v32 = vpop.xlane.xlu1 %702 }
 0x301   : > { %989 = vrcp.f32 %v703_v32  ;;  %v694_v34 = vpop.xlane.xlu0 %693 }
 0x302   : > { %762 = vst.msk [vmem:[%s1272_s19 + $0x10] sm:$0xff] %vm583_vm2, %v733_v31  ;;  %991 = vrcp.f32 %v694_v34 }
 0x303   : > { %v982_v35 = vpop.eup %981 }
 0x304   : > { %v984_v36 = vpop.eup %983  ;;  %v735_v37 = vmul.f32 %v982_v35, %v1202_v38  ;;  %v697_v39 = vpop.xlane.xlu1 %696 }
 0x305   : > { %v729_v40 = vmul.f32 %v984_v36, %v1199_v33  ;;  %993 = vrcp.f32 %v697_v39  ;;  %v712_v41 = vpop.xlane.xlu0 %711 }
 0x306   : > { %763 = vst.msk [vmem:[%s1272_s19 + $0x18] sm:$0xff] %vm583_vm2, %v735_v37  ;;  %995 = vrcp.f32 %v712_v41 }
 0x307   : > { %v986_v29 = vpop.eup %985  ;;  %760 = vst.msk [vmem:[%s1272_s19] sm:$0xff] %vm583_vm2, %v729_v40 }
 0x308   : > { %v988_v42 = vpop.eup %987  ;;  %v731_v44 = vmul.f32 %v986_v29, %v1209_v43  ;;  %v715_v45 = vpop.xlane.xlu1 %714 }
 0x309   : > { %v741_v46 = vmul.f32 %v988_v42, %v1213_v49  ;;  %997 = vrcp.f32 %v715_v45  ;;  %v706_v38 = vpop.xlane.xlu0 %705 }
 0x30a   : > { %761 = vst.msk [vmem:[%s1272_s19 + $0x8] sm:$0xff] %vm583_vm2, %v731_v44  ;;  %999 = vrcp.f32 %v706_v38 }
 0x30b   : > { %v990_v33 = vpop.eup %989  ;;  %766 = vst.msk [vmem:[%s1272_s19 + $0x30] sm:$0xff] %vm583_vm2, %v741_v46 }
 0x30c   : > { %v992_v47 = vpop.eup %991  ;;  %v743_v48 = vmul.f32 %v990_v33, %v1217_v52  ;;  %v709_v50 = vpop.xlane.xlu1 %708 }
 0x30d   : > { %v737_v51 = vmul.f32 %v992_v47, %v1222_v58  ;;  %1001 = vrcp.f32 %v709_v50  ;;  %v718_v43 = vpop.xlane.xlu0 %717 }
 0x30e   : > { %767 = vst.msk [vmem:[%s1272_s19 + $0x38] sm:$0xff] %vm583_vm2, %v743_v48  ;;  %1003 = vrcp.f32 %v718_v43 }
 0x30f   : > { %v994_v49 = vpop.eup %993  ;;  %764 = vst.msk [vmem:[%s1272_s19 + $0x20] sm:$0xff] %vm583_vm2, %v737_v51 }
 0x310   : > { %v996_v53 = vpop.eup %995  ;;  %v739_v54 = vmul.f32 %v994_v49, %v1227_v63  ;;  %v721_v57 = vpop.xlane.xlu1 %720 }
 0x311   : > { %v749_v52 = vmul.f32 %v996_v53, %v1232_v7  ;;  %1005 = vrcp.f32 %v721_v57  ;;  %v724_v55 = vpop.xlane.xlu0 %723 }
 0x312   : > { %765 = vst.msk [vmem:[%s1272_s19 + $0x28] sm:$0xff] %vm583_vm2, %v739_v54  ;;  %1007 = vrcp.f32 %v724_v55 }
 0x313   : > { %v998_v56 = vpop.eup %997  ;;  %770 = vst.msk [vmem:[%s1272_s19 + $0x50] sm:$0xff] %vm583_vm2, %v749_v52 }
 0x314   : > { %v1000_v58 = vpop.eup %999  ;;  %v751_v59 = vmul.f32 %v998_v56, %v1237_v10  ;;  %v727_v60 = vpop.xlane.xlu1 %726 }
 0x315   : > { %v745_v61 = vmul.f32 %v1000_v58, %v1241_v1  ;;  %1009 = vrcp.f32 %v727_v60 }
 0x316   : > { %771 = vst.msk [vmem:[%s1272_s19 + $0x58] sm:$0xff] %vm583_vm2, %v751_v59 }
 0x317   : > { %v1002_v63 = vpop.eup %1001  ;;  %768 = vst.msk [vmem:[%s1272_s19 + $0x40] sm:$0xff] %vm583_vm2, %v745_v61 }
 0x318   : > { %v1004_v0 = vpop.eup %1003  ;;  %v747_v3 = vmul.f32 %v1002_v63, %v1245_v14 }
 0x319   : > { %v753_v62 = vmul.f32 %v1004_v0, %v1249_v15 }
 0x31a   : > { %769 = vst.msk [vmem:[%s1272_s19 + $0x48] sm:$0xff] %vm583_vm2, %v747_v3 }
 0x31b   : > { %v1006_v5 = vpop.eup %1005  ;;  %772 = vst.msk [vmem:[%s1272_s19 + $0x60] sm:$0xff] %vm583_vm2, %v753_v62 }
 0x31c   : > { %v1008_v6 = vpop.eup %1007  ;;  %v755_v7 = vmul.f32 %v1006_v5, %v1255_v18 }
 0x31d   : > { %v757_v2 = vmul.f32 %v1008_v6, %v1259_v20 }
 0x31e   : > { %773 = vst.msk [vmem:[%s1272_s19 + $0x68] sm:$0xff] %vm583_vm2, %v755_v7 }
 0x31f   : > { %v1010_v8 = vpop.eup %1009  ;;  %774 = vst.msk [vmem:[%s1272_s19 + $0x70] sm:$0xff] %vm583_vm2, %v757_v2 }
 0x320   : > { %v759_v9 = vmul.f32 %v1010_v8, %v1263_v22 }
 0x322   : > { %775 = vst.msk [vmem:[%s1272_s19 + $0x78] sm:$0xff] %vm583_vm2, %v759_v9 }
 0x323 PF: > { %s15_s18 = sadd.s32 1, %s1017_s18  }
 0x324   : > { %p12_p4 = scmp.ge.s32.totalorder %s15_s18, 4  }
 0x326   :  { %14 = sbr.rel (!%p12_p4) target bundleno = 1 (0x1), region = 70 }

</bundles_post_ra>
